<compile_context>
chip_gen: v7x
topology: tpu7x:2x2x1
jax: 0.10.0
libtpu: 0.0.40
codegen_flags: <defaults>
</compile_context>

<pallas_src>
import functools

import jax
import jax.numpy as jnp
from jax.experimental import pallas as pl
from jax.experimental.pallas import tpu as pltpu


def _vmem_limit():
    """~85% of physical VMEM (128 MiB on v5e/v6e, 64 MiB on v7x); 64 MiB fallback."""
    try:
        return int(pltpu.get_tpu_info().vmem_capacity_bytes * 0.85)
    except Exception:
        return 64 * 1024 * 1024


def _pick_tile(n, target, dtype=jnp.float32):
    """Largest sequence tile <= target that divides n, dtype-aware sublane alignment."""
    align = {4: 8, 2: 16, 1: 32}.get(jnp.dtype(dtype).itemsize, 8)
    if n <= target:
        return n
    for a in (align, 8):                      # prefer packed alignment, then plain sublane
        for t in range(target, a - 1, -1):
            if n % t == 0 and t % a == 0:
                return t
    # TODO(synk): pad + mask awkward sequence lengths instead of an untiled fallback.
    return n


def _layernorm_f32(x32, g32, b32, eps=1e-5):
    mu = jnp.mean(x32, axis=-1, keepdims=True)
    var = jnp.mean((x32 - mu) ** 2, axis=-1, keepdims=True)
    return (x32 - mu) * jax.lax.rsqrt(var + eps) * g32 + b32


# ----------------------- kernel 1: LN + fused QKV projection -----------------------

def qkv_proj_kernel(x_ref, g_ref, b_ref, wqkv_ref, qkv_ref, *, num_heads):
    x = x_ref[0]                                             # (tn, D), native dtype
    xn = _layernorm_f32(x.astype(jnp.float32),
                        g_ref[0].astype(jnp.float32),
                        b_ref[0].astype(jnp.float32)).astype(wqkv_ref.dtype)
    # One MXU op for Q, K and V together (sm_scale already folded into the q columns).
    qkv = jnp.dot(xn, wqkv_ref[...], preferred_element_type=jnp.float32)   # (tn, 3D)
    tn = qkv.shape[0]
    hd = qkv.shape[1] // (3 * num_heads)
    # Head-major restructuring done once per token tile; ONE combined store
    # (instead of 3*H separate per-head stores).
    heads = [qkv[:, g * hd:(g + 1) * hd] for g in range(3 * num_heads)]
    qkv_ref[0] = jnp.stack(heads, axis=0).astype(qkv_ref.dtype)            # (3H, tn, hd)


# --------------------- kernel 2: flash attention + Wo + residual --------------------

def flash_attn_kernel(x_ref, q_ref, k_ref, v_ref, wo_ref, o_ref,
                      m_sc, l_sc, acc_sc, *, num_heads):
    ki = pl.program_id(2)

    @pl.when(ki == 0)
    def _init():
        m_sc[...] = jnp.full_like(m_sc, -jnp.inf)
        l_sc[...] = jnp.zeros_like(l_sc)
        acc_sc[...] = jnp.zeros_like(acc_sc)

    q = q_ref[0]                                             # (H, tq, hd), pre-scaled
    k = k_ref[0]                                             # (H, tk, hd)
    v = v_ref[0]                                             # (H, tk, hd)

    # Heads batched in a single dot_general; scores only for this (tq, tk) tile.
    s = jnp.einsum("hqd,hkd->hqk", q, k, preferred_element_type=jnp.float32)
    m_prev = m_sc[...]
    m_new = jnp.maximum(m_prev, jnp.max(s, axis=-1, keepdims=True))
    alpha = jnp.exp(m_prev - m_new)
    p = jnp.exp(s - m_new)
    l_sc[...] = alpha * l_sc[...] + jnp.sum(p, axis=-1, keepdims=True)
    acc_sc[...] = alpha * acc_sc[...] + jnp.einsum(
        "hqk,hkd->hqd", p.astype(v.dtype), v, preferred_element_type=jnp.float32)
    m_sc[...] = m_new

    @pl.when(ki == pl.num_programs(2) - 1)
    def _finalize():
        # Exact normalization (no approx-reciprocal bias), then ONE K=D contraction
        # against Wo instead of H per-head matmuls.
        attn = acc_sc[...] / l_sc[...]                       # (H, tq, hd) fp32
        attn2d = jnp.concatenate([attn[h] for h in range(num_heads)], axis=-1)  # (tq, D)
        y = x_ref[0].astype(jnp.float32) + jnp.dot(
            attn2d.astype(wo_ref.dtype), wo_ref[...], preferred_element_type=jnp.float32)
        o_ref[0] = y.astype(o_ref.dtype)


# --------------------------- kernel 3: LN + GLU + residual ---------------------------

def glu_kernel(x_ref, g_ref, b_ref, w12_ref, w3_ref, o_ref):
    x = x_ref[0]                                             # (tn, D)
    xn = _layernorm_f32(x.astype(jnp.float32),
                        g_ref[0].astype(jnp.float32),
                        b_ref[0].astype(jnp.float32)).astype(w12_ref.dtype)
    # w1 || w2 fused: one MXU push sequence, one weight DMA stream.
    h = jnp.dot(xn, w12_ref[...], preferred_element_type=jnp.float32)      # (tn, 2M)
    m = w3_ref.shape[0]
    hidden = (jax.nn.silu(h[:, :m]) * h[:, m:]).astype(w3_ref.dtype)       # fp32 math
    y = jnp.dot(hidden, w3_ref[...], preferred_element_type=jnp.float32)
    o_ref[0] = (x.astype(jnp.float32) + y).astype(o_ref.dtype)


# ---------------------------------- python wrappers ----------------------------------

def _qkv_proj(x, ln_g, ln_b, wqkv, *, num_heads, seq_tile=256):
    B, N, D = x.shape
    hd = D // num_heads
    tn = _pick_tile(N, seq_tile, x.dtype)
    kernel = functools.partial(qkv_proj_kernel, num_heads=num_heads)
    # Constant-index params: single-buffered (no wasted second VMEM buffer).
    g_spec = pl.BlockSpec((1, D), lambda b, i: (0, 0), pipeline_mode=pl.Buffered(1))
    w_spec = pl.BlockSpec((D, 3 * D), lambda b, i: (0, 0), pipeline_mode=pl.Buffered(1))
    return pl.pallas_call(
        kernel,
        out_shape=jax.ShapeDtypeStruct((B, 3 * num_heads, N, hd), x.dtype),
        grid=(B, N // tn),
        in_specs=[
            pl.BlockSpec((1, tn, D), lambda b, i: (b, i, 0)),
            g_spec, g_spec, w_spec,
        ],
        out_specs=pl.BlockSpec((1, 3 * num_heads, tn, hd), lambda b, i: (b, 0, i, 0)),
        compiler_params=pltpu.CompilerParams(
            dimension_semantics=("parallel", "parallel"),
            vmem_limit_bytes=_vmem_limit()),
    )(x, ln_g, ln_b, wqkv)


def attn_block(x, ln_g, ln_b, wqkv, wo, *, num_heads, q_tile=256, k_tile=256):
    # NOTE: k_tile default kept at 256 so per-step (H,tq,tk) fp32 temporaries fit v7x
    # VMEM; v5e/v6e (128 MiB) can raise it to 512 for fewer grid steps.
    B, N, D = x.shape
    hd = D // num_heads
    qkv = _qkv_proj(x, ln_g, ln_b, wqkv, num_heads=num_heads)   # (B, 3H, N, hd)

    tq = _pick_tile(N, q_tile, x.dtype)
    tk = _pick_tile(N, k_tile, x.dtype)
    kernel = functools.partial(flash_attn_kernel, num_heads=num_heads)
    # q / k / v are three windows into the same combined qkv array (head-group blocks).
    q_spec = pl.BlockSpec((1, num_heads, tq, hd), lambda b, qi, ki: (b, 0, qi, 0))
    k_spec = pl.BlockSpec((1, num_heads, tk, hd), lambda b, qi, ki: (b, 1, ki, 0))
    v_spec = pl.BlockSpec((1, num_heads, tk, hd), lambda b, qi, ki: (b, 2, ki, 0))
    x_spec = pl.BlockSpec((1, tq, D), lambda b, qi, ki: (b, qi, 0),
                          pipeline_mode=pl.Buffered(1))           # residual q-tile
    wo_spec = pl.BlockSpec((D, D), lambda b, qi, ki: (0, 0),
                           pipeline_mode=pl.Buffered(1))
    return pl.pallas_call(
        kernel,
        out_shape=jax.ShapeDtypeStruct((B, N, D), x.dtype),
        grid=(B, N // tq, N // tk),
        in_specs=[x_spec, q_spec, k_spec, v_spec, wo_spec],
        out_specs=pl.BlockSpec((1, tq, D), lambda b, qi, ki: (b, qi, 0)),
        scratch_shapes=[
            pltpu.VMEM((num_heads, tq, 1), jnp.float32),   # running max
            pltpu.VMEM((num_heads, tq, 1), jnp.float32),   # running denom
            pltpu.VMEM((num_heads, tq, hd), jnp.float32),  # fp32 accumulator
        ],
        compiler_params=pltpu.CompilerParams(
            dimension_semantics=("parallel", "parallel", "arbitrary"),
            vmem_limit_bytes=_vmem_limit()),
    )(x, qkv, qkv, qkv, wo)


def glu_block(x, ln_g, ln_b, w12, w3, *, seq_tile=256):
    B, N, D = x.shape
    M2 = w12.shape[1]
    M = w3.shape[0]
    tn = _pick_tile(N, seq_tile, x.dtype)
    g_spec = pl.BlockSpec((1, D), lambda b, i: (0, 0), pipeline_mode=pl.Buffered(1))
    return pl.pallas_call(
        glu_kernel,
        out_shape=jax.ShapeDtypeStruct((B, N, D), x.dtype),
        grid=(B, N // tn),
        in_specs=[
            pl.BlockSpec((1, tn, D), lambda b, i: (b, i, 0)),
            g_spec, g_spec,
            pl.BlockSpec((D, M2), lambda b, i: (0, 0), pipeline_mode=pl.Buffered(1)),
            pl.BlockSpec((M, D), lambda b, i: (0, 0), pipeline_mode=pl.Buffered(1)),
        ],
        out_specs=pl.BlockSpec((1, tn, D), lambda b, i: (b, i, 0)),
        compiler_params=pltpu.CompilerParams(
            dimension_semantics=("parallel", "parallel"),
            vmem_limit_bytes=_vmem_limit()),
    )(x, ln_g, ln_b, w12, w3)


def prepare_params(params, *, num_heads):
    """One-time parameter prep: fuse QKV / w1||w2 and fold sm_scale into the q columns
    so no (D,3D)/(D,2M) concatenation is re-materialized in HBM on every forward call."""
    D = params["wq"].shape[0]
    hd = D // num_heads
    sm_scale = 1.0 / (hd ** 0.5)
    out = dict(params)
    out["wqkv"] = jnp.concatenate(
        [params["wq"] * sm_scale, params["wk"], params["wv"]], axis=1)     # (D, 3D)
    out["w12"] = jnp.concatenate([params["w1"], params["w2"]], axis=1)     # (D, 2M)
    return out


def transformer_layer(x, prepared, *, num_heads):
    # x = x + token_mixer(token_norm(x))
    x = attn_block(x, prepared["tok_g"], prepared["tok_b"],
                   prepared["wqkv"], prepared["wo"], num_heads=num_heads)
    # x = x + channel_mixer(channel_norm(x))
    x = glu_block(x, prepared["ch_g"], prepared["ch_b"],
                  prepared["w12"], prepared["w3"])
    return x


# ------------------------------- pure-JAX reference ----------------------------------

def _ref_layer(x, p, num_heads):
    def ln(z, g, b):
        mu = z.mean(-1, keepdims=True)
        var = ((z - mu) ** 2).mean(-1, keepdims=True)
        return (z - mu) / jnp.sqrt(var + 1e-5) * g + b

    B, N, D = x.shape
    hd = D // num_heads
    xn = ln(x, p["tok_g"][0], p["tok_b"][0])
    q = xn @ p["wq"]; k = xn @ p["wk"]; v = xn @ p["wv"]
    q = q.reshape(B, N, num_heads, hd).transpose(0, 2, 1, 3)
    k = k.reshape(B, N, num_heads, hd).transpose(0, 2, 1, 3)
    v = v.reshape(B, N, num_heads, hd).transpose(0, 2, 1, 3)
    s = jnp.einsum("bhqd,bhkd->bhqk", q, k) / jnp.sqrt(hd)
    a = jax.nn.softmax(s, axis=-1)
    o = jnp.einsum("bhqk,bhkd->bhqd", a, v).transpose(0, 2, 1, 3).reshape(B, N, D)
    x = x + o @ p["wo"]
    xn = ln(x, p["ch_g"][0], p["ch_b"][0])
    x = x + (jax.nn.silu(xn @ p["w1"]) * (xn @ p["w2"])) @ p["w3"]
    return x


# ------------------------------------- main -------------------------------------------

if __name__ == "__main__":
    B, N, D, H, M = 2, 8, 32, 4, 64   # batch, seq, hidden_channels, num_heads, mid_dim

    key = jax.random.PRNGKey(0)
    keys = jax.random.split(key, 9)
    scale = 0.05
    params = {
        "tok_g": jnp.ones((1, D), jnp.float32),
        "tok_b": jnp.zeros((1, D), jnp.float32),
        "ch_g": jnp.ones((1, D), jnp.float32),
        "ch_b": jnp.zeros((1, D), jnp.float32),
        "wq": scale * jax.random.normal(keys[0], (D, D), jnp.float32),
        "wk": scale * jax.random.normal(keys[1], (D, D), jnp.float32),
        "wv": scale * jax.random.normal(keys[2], (D, D), jnp.float32),
        "wo": scale * jax.random.normal(keys[3], (D, D), jnp.float32),
        "w1": scale * jax.random.normal(keys[4], (D, M), jnp.float32),
        "w2": scale * jax.random.normal(keys[5], (D, M), jnp.float32),
        "w3": scale * jax.random.normal(keys[6], (M, D), jnp.float32),
    }
    x = jax.random.normal(keys[7], (B, N, D), jnp.float32)

    prepared = prepare_params(params, num_heads=H)
    out = transformer_layer(x, prepared, num_heads=H)
    out = jax.block_until_ready(out)

    ref = _ref_layer(x, params, H)
    assert out.shape == (B, N, D)
    assert jnp.allclose(out, ref, atol=1e-4, rtol=1e-4), "mismatch vs pure-JAX reference"

    print("KERNEL_OK")
</pallas_src>

<mosaic_0001>
module attributes {stable_mosaic.version = 11 : i64} {
  func.func @qkv_proj_kernel(%arg0: i32, %arg1: i32, %arg2: memref<1x8x32xf32, #tpu.memory_space<vmem>>, %arg3: memref<1x32xf32, #tpu.memory_space<vmem>>, %arg4: memref<1x32xf32, #tpu.memory_space<vmem>>, %arg5: memref<32x96xf32, #tpu.memory_space<vmem>>, %arg6: memref<1x12x8x8xf32, #tpu.memory_space<vmem>>) attributes {dimension_semantics = [#tpu.dimension_semantics<parallel>, #tpu.dimension_semantics<parallel>], iteration_bounds = array<i64: 2, 1>, scalar_prefetch = 0 : i64, scratch_operands = 0 : i64, tpu.core_type = #tpu.core_type<tc>, window_params = [{transform_indices = @transform_0, window_bounds = array<i64: 1, 8, 32>}, {pipeline_mode = #tpu.pipeline_mode<synchronous>, transform_indices = @transform_1, window_bounds = array<i64: 1, 32>}, {pipeline_mode = #tpu.pipeline_mode<synchronous>, transform_indices = @transform_2, window_bounds = array<i64: 1, 32>}, {pipeline_mode = #tpu.pipeline_mode<synchronous>, transform_indices = @transform_3, window_bounds = array<i64: 32, 96>}, {transform_indices = @transform_4, window_bounds = array<i64: 1, 12, 8, 8>}]} {
    %c0 = arith.constant 0 : index
    %c0_0 = arith.constant 0 : index
    %c0_1 = arith.constant 0 : index
    %0 = vector.load %arg2[%c0, %c0_0, %c0_1] : memref<1x8x32xf32, #tpu.memory_space<vmem>>, vector<1x8x32xf32>
    %1 = vector.shape_cast %0 : vector<1x8x32xf32> to vector<8x32xf32>
    %c0_2 = arith.constant 0 : index
    %c0_3 = arith.constant 0 : index
    %2 = vector.load %arg3[%c0_2, %c0_3] : memref<1x32xf32, #tpu.memory_space<vmem>>, vector<1x32xf32>
    %3 = vector.shape_cast %2 : vector<1x32xf32> to vector<32xf32>
    %c0_4 = arith.constant 0 : index
    %c0_5 = arith.constant 0 : index
    %4 = vector.load %arg4[%c0_4, %c0_5] : memref<1x32xf32, #tpu.memory_space<vmem>>, vector<1x32xf32>
    %5 = vector.shape_cast %4 : vector<1x32xf32> to vector<32xf32>
    %cst = arith.constant dense<0.000000e+00> : vector<8xf32>
    %6 = vector.multi_reduction <add>, %1, %cst [1] : vector<8x32xf32> to vector<8xf32>
    %7 = vector.shape_cast %6 : vector<8xf32> to vector<8x1xf32>
    %cst_6 = arith.constant 3.200000e+01 : f32
    %8 = vector.broadcast %cst_6 : f32 to vector<8x1xf32>
    %9 = arith.divf %7, %8 : vector<8x1xf32>
    %10 = vector.broadcast %9 : vector<8x1xf32> to vector<8x32xf32>
    %11 = arith.subf %1, %10 : vector<8x32xf32>
    %12 = arith.mulf %11, %11 : vector<8x32xf32>
    %cst_7 = arith.constant dense<0.000000e+00> : vector<8xf32>
    %13 = vector.multi_reduction <add>, %12, %cst_7 [1] : vector<8x32xf32> to vector<8xf32>
    %14 = vector.shape_cast %13 : vector<8xf32> to vector<8x1xf32>
    %cst_8 = arith.constant 3.200000e+01 : f32
    %15 = vector.broadcast %cst_8 : f32 to vector<8x1xf32>
    %16 = arith.divf %14, %15 : vector<8x1xf32>
    %17 = vector.broadcast %9 : vector<8x1xf32> to vector<8x32xf32>
    %18 = arith.subf %1, %17 : vector<8x32xf32>
    %cst_9 = arith.constant 9.99999974E-6 : f32
    %19 = vector.broadcast %cst_9 : f32 to vector<8x1xf32>
    %20 = arith.addf %16, %19 : vector<8x1xf32>
    %21 = math.rsqrt %20 : vector<8x1xf32>
    %22 = vector.broadcast %21 : vector<8x1xf32> to vector<8x32xf32>
    %23 = arith.mulf %18, %22 : vector<8x32xf32>
    %24 = vector.shape_cast %3 : vector<32xf32> to vector<1x32xf32>
    %25 = vector.broadcast %24 : vector<1x32xf32> to vector<8x32xf32>
    %26 = arith.mulf %23, %25 : vector<8x32xf32>
    %27 = vector.shape_cast %5 : vector<32xf32> to vector<1x32xf32>
    %28 = vector.broadcast %27 : vector<1x32xf32> to vector<8x32xf32>
    %29 = arith.addf %26, %28 : vector<8x32xf32>
    %c0_10 = arith.constant 0 : index
    %c0_11 = arith.constant 0 : index
    %30 = vector.load %arg5[%c0_10, %c0_11] : memref<32x96xf32, #tpu.memory_space<vmem>>, vector<32x96xf32>
    %cst_12 = arith.constant dense<0.000000e+00> : vector<8x96xf32>
    %31 = tpu.matmul %29, %30, %cst_12 {dimension_numbers = #tpu.dot_dimension_numbers<[1], [0], [0], [1], [0, 0, 1, 1], [], []>} : vector<8x32xf32>, vector<32x96xf32>, vector<8x96xf32> -> vector<8x96xf32>
    %32 = vector.extract_strided_slice %31 {offsets = [0, 0], sizes = [8, 8], strides = [1, 1]} : vector<8x96xf32> to vector<8x8xf32>
    %33 = vector.extract_strided_slice %31 {offsets = [0, 8], sizes = [8, 8], strides = [1, 1]} : vector<8x96xf32> to vector<8x8xf32>
    %34 = vector.extract_strided_slice %31 {offsets = [0, 16], sizes = [8, 8], strides = [1, 1]} : vector<8x96xf32> to vector<8x8xf32>
    %35 = vector.extract_strided_slice %31 {offsets = [0, 24], sizes = [8, 8], strides = [1, 1]} : vector<8x96xf32> to vector<8x8xf32>
    %36 = vector.extract_strided_slice %31 {offsets = [0, 32], sizes = [8, 8], strides = [1, 1]} : vector<8x96xf32> to vector<8x8xf32>
    %37 = vector.extract_strided_slice %31 {offsets = [0, 40], sizes = [8, 8], strides = [1, 1]} : vector<8x96xf32> to vector<8x8xf32>
    %38 = vector.extract_strided_slice %31 {offsets = [0, 48], sizes = [8, 8], strides = [1, 1]} : vector<8x96xf32> to vector<8x8xf32>
    %39 = vector.extract_strided_slice %31 {offsets = [0, 56], sizes = [8, 8], strides = [1, 1]} : vector<8x96xf32> to vector<8x8xf32>
    %40 = vector.extract_strided_slice %31 {offsets = [0, 64], sizes = [8, 8], strides = [1, 1]} : vector<8x96xf32> to vector<8x8xf32>
    %41 = vector.extract_strided_slice %31 {offsets = [0, 72], sizes = [8, 8], strides = [1, 1]} : vector<8x96xf32> to vector<8x8xf32>
    %42 = vector.extract_strided_slice %31 {offsets = [0, 80], sizes = [8, 8], strides = [1, 1]} : vector<8x96xf32> to vector<8x8xf32>
    %43 = vector.extract_strided_slice %31 {offsets = [0, 88], sizes = [8, 8], strides = [1, 1]} : vector<8x96xf32> to vector<8x8xf32>
    %44 = vector.shape_cast %32 : vector<8x8xf32> to vector<1x8x8xf32>
    %45 = vector.shape_cast %33 : vector<8x8xf32> to vector<1x8x8xf32>
    %46 = vector.shape_cast %34 : vector<8x8xf32> to vector<1x8x8xf32>
    %47 = vector.shape_cast %35 : vector<8x8xf32> to vector<1x8x8xf32>
    %48 = vector.shape_cast %36 : vector<8x8xf32> to vector<1x8x8xf32>
    %49 = vector.shape_cast %37 : vector<8x8xf32> to vector<1x8x8xf32>
    %50 = vector.shape_cast %38 : vector<8x8xf32> to vector<1x8x8xf32>
    %51 = vector.shape_cast %39 : vector<8x8xf32> to vector<1x8x8xf32>
    %52 = vector.shape_cast %40 : vector<8x8xf32> to vector<1x8x8xf32>
    %53 = vector.shape_cast %41 : vector<8x8xf32> to vector<1x8x8xf32>
    %54 = vector.shape_cast %42 : vector<8x8xf32> to vector<1x8x8xf32>
    %55 = vector.shape_cast %43 : vector<8x8xf32> to vector<1x8x8xf32>
    %56 = tpu.concatenate %44, %45, %46, %47, %48, %49, %50, %51, %52, %53, %54, %55 in 0 : vector<1x8x8xf32>, vector<1x8x8xf32>, vector<1x8x8xf32>, vector<1x8x8xf32>, vector<1x8x8xf32>, vector<1x8x8xf32>, vector<1x8x8xf32>, vector<1x8x8xf32>, vector<1x8x8xf32>, vector<1x8x8xf32>, vector<1x8x8xf32>, vector<1x8x8xf32> -> vector<12x8x8xf32>
    %c0_13 = arith.constant 0 : index
    %c0_14 = arith.constant 0 : index
    %c0_15 = arith.constant 0 : index
    %c0_16 = arith.constant 0 : index
    %57 = vector.load %arg6[%c0_13, %c0_14, %c0_15, %c0_16] : memref<1x12x8x8xf32, #tpu.memory_space<vmem>>, vector<1x12x8x8xf32>
    %58 = vector.shape_cast %57 : vector<1x12x8x8xf32> to vector<12x8x8xf32>
    %59 = vector.shape_cast %56 : vector<12x8x8xf32> to vector<1x12x8x8xf32>
    tpu.vector_store %arg6[%c0_13, %c0_14, %c0_15, %c0_16], %59 {strides = array<i32>} : memref<1x12x8x8xf32, #tpu.memory_space<vmem>>, vector<1x12x8x8xf32>,
    return
  }
  func.func @transform_0(%arg0: i32, %arg1: i32) -> (i32, i32, i32) {
    %c0_i32 = arith.constant 0 : i32
    %c0_i32_0 = arith.constant 0 : i32
    return %arg0, %arg1, %c0_i32 : i32, i32, i32
  }
  func.func @transform_1(%arg0: i32, %arg1: i32) -> (i32, i32) {
    %c0_i32 = arith.constant 0 : i32
    %c0_i32_0 = arith.constant 0 : i32
    %c0_i32_1 = arith.constant 0 : i32
    return %c0_i32, %c0_i32_0 : i32, i32
  }
  func.func @transform_2(%arg0: i32, %arg1: i32) -> (i32, i32) {
    %c0_i32 = arith.constant 0 : i32
    %c0_i32_0 = arith.constant 0 : i32
    %c0_i32_1 = arith.constant 0 : i32
    return %c0_i32, %c0_i32_0 : i32, i32
  }
  func.func @transform_3(%arg0: i32, %arg1: i32) -> (i32, i32) {
    %c0_i32 = arith.constant 0 : i32
    %c0_i32_0 = arith.constant 0 : i32
    %c0_i32_1 = arith.constant 0 : i32
    return %c0_i32, %c0_i32_0 : i32, i32
  }
  func.func @transform_4(%arg0: i32, %arg1: i32) -> (i32, i32, i32, i32) {
    %c0_i32 = arith.constant 0 : i32
    %c0_i32_0 = arith.constant 0 : i32
    %c0_i32_1 = arith.constant 0 : i32
    return %arg0, %c0_i32, %arg1, %c0_i32_0 : i32, i32, i32, i32
  }
}

</mosaic_0001>

<bundles_post_ra>
// kernel: tpu_custom_call.1
= control target key start
LH: loop header
LB: loop body
LE: loop exit
PB: predicated region body
PF: predicated region fallthrough
CT: control target
= control target key end

     0   :  { %9 = vsyncpa [#allocation3], 0  ;;  %s1271_s0 = inlined_call_operand.hbm [shape: f32[2,8,32], index: 0, kind: input, shape index: {}]   ;;  %s1272_s1 = inlined_call_operand.hbm [shape: f32[1,32], index: 1, kind: input, shape index: {}]   ;;  %s1273_s2 = inlined_call_operand.hbm [shape: f32[1,32], index: 2, kind: input, shape index: {}]   ;;  %s1274_s3 = inlined_call_operand.hbm [shape: f32[32,96], index: 3, kind: input, shape index: {}]   ;;  %s1275_s4 = inlined_call_operand.hbm [shape: f32[2,12,8,8], index: 4, kind: output, shape index: {}]  }
   0x1   :  { %11 = vsyncpa [#allocation3 + $0x1], 0 }
   0x2   :  { %12 = vsyncpa [#allocation6], 0 }
   0x3   :  { %13 = vsyncpa [#allocation9], 0 }
   0x4   :  { %14 = vsyncpa [#allocation4], 0 }
   0x5   :  { %16 = vsyncpa [#allocation4 + $0x1], 0  ;;  %s965_s15 = smov 0   ;;  %s967_s16 = smov 0  }
   0x6   :  { %s969_s17 = smov 0   ;;  %s971_s18 = smov 0  }
   0x7   :  { %s973_s19 = smov 0   ;;  %s975_s20 = smov 0  }
   0x8 LB: > { %s554_s21 = sadd.s32 4294967295, %s915_s20   ;;  %s555_s22 = sadd.s32 4294967294, %s915_s20   ;;  %s915_s20 = sphi %s975_s20, %s22_s20   ;;  %s911_s19 = sphi %s973_s19, %s1299_s19   ;;  %s907_s18 = sphi %s971_s18, %s1298_s18   ;;  %s903_s17 = sphi %s969_s17, %s1297_s17   ;;  %s899_s16 = sphi %s967_s16, %s1296_s16   ;;  %s895_s15 = sphi %s965_s15, %s1295_s15  }
   0x9   : > { %p56_p0 = scmp.ne.s32.totalorder %s899_s16, %s895_s15  ;;  %p999_p1 = scmp.eq.s32.totalorder %s554_s21, 0 }
   0xa   : > { %p1003_p2 = scmp.eq.s32.totalorder %s554_s21, 1  ;;  %p151_p3 = scmp.eq.s32.totalorder %s555_s22, 1 }
   0xb   : > { %s1280_s23 = scalar_select %p999_p1, 1, 0 }
   0xc   : > { %s1281_s24 = scalar_select %p1003_p2, 1, 0 }
   0xd   : > { %p1009_p4 = por %p999_p1, %p56_p0  ;;  %p556_p5 = scmp.ge.s32.totalorder %s915_s20, 1 }
   0xe   : > { %p1014_p6 = por %p151_p3, %p56_p0  ;;  %p158_p7 = scmp.lt.s32.totalorder %s915_s20, 3 }
   0xf   : > { %s1282_s25 = scalar_select %p1009_p4, 1, 0 }
  0x10   : > { %s1283_s26 = scalar_select %p1014_p6, 1, 0 }
  0x11   : > { %p1019_p8 = pnand %p556_p5, %p158_p7  ;;  %s917_s28 = smov [#allocation5]  }
  0x12   : > { %s171_s29 = sshll.u32 %s917_s28, 4  ;;  %s918_s30 = smov [#allocation7]   ;;  %s172_s29 = int_to_ptr.vmem [resolvable:$true] %s171_s29 }
  0x13   : > { %s1284_s27 = scalar_select %p1019_p8, 1, 0 }
  0x14   : > { %p614_p10 = pneg %p1019_p8  ;;  %s182_s5 = sshll.u32 %s918_s30, 4  ;;  %s1032_s5 = int_to_ptr.vmem [resolvable:$true] %s182_s5 }
  0x15   : > { %s919_s7 = smov [#allocation8]   ;;  %s711_s11 = scalar_lea.hbm %s1272_s1, 16 }
  0x16   : > { %p1028_p11 = pnand %p614_p10, %p999_p1  ;;  %s192_s8 = sshll.u32 %s919_s7, 4  ;;  %s1034_s8 = int_to_ptr.vmem [resolvable:$true] %s192_s8 }
  0x17   : > { %p712_p12 = scmp.ne.s32.totalorder %s1272_s1, %s711_s11  ;;  %p718_p5 = scmp.lt.u32.totalorder %s711_s11, %s1272_s1 }
  0x18   : > { %p1044_p13 = pneg %p1028_p11 }
  0x1a   : > { %p714_p0 = pnand %p1044_p13, %p712_p12 }
  0x1c   : > { %p715_p3 = pneg %p714_p0 }
  0x1e   : > { %p720_p7 = pnand %p718_p5, %p715_p3 }
  0x20   : > { %723 = shalt.err (!%p720_p7)
}
  0x21   : > { %s724_s28 = scalar_lea.vmem %s172_s29, 16  ;;  %s731_s30 = scalar_lea.vmem %s172_s29, 32 }
  0x22   : > { %p725_p10 = scmp.ne.s32.totalorder %s172_s29, %s724_s28  ;;  %p732_p1 = scmp.lt.s32.totalorder %s172_s29, %s172_s29 }
  0x23   : > { %p733_p4 = scmp.lt.s32.totalorder %s731_s30, %s724_s28 }
  0x24   : > { %p727_p9 = pnand %p725_p10, %p1044_p13 }
  0x25   : > { %p734_p8 = por %p733_p4, %p732_p1 }
  0x26   : > { %p728_p6 = pneg %p727_p9 }
  0x28   : > { %p735_p2 = pnand %p734_p8, %p728_p6 }
  0x2a   : > { %738 = shalt.err (!%p735_p2)
}
  0x2b   : > { %617 = dma.hbm_to_vmem [thread:$0]  (!%p1028_p11), %s1272_s1, 16, %s172_s29, [#allocation6]  }
  0x2c   : > { %s739_s12 = scalar_lea.hbm %s1273_s2, 16 }
  0x2d   : > { %p740_p9 = scmp.ne.s32.totalorder %s1273_s2, %s739_s12  ;;  %p746_p2 = scmp.lt.u32.totalorder %s739_s12, %s1273_s2 }
  0x2f   : > { %p742_p12 = pnand %p740_p9, %p1044_p13 }
  0x31   : > { %p743_p1 = pneg %p742_p12 }
  0x33   : > { %p748_p4 = pnand %p746_p2, %p743_p1 }
  0x35   : > { %751 = shalt.err (!%p748_p4)
}
  0x36   : > { %s752_s29 = scalar_lea.vmem %s1032_s5, 16  ;;  %s759_s30 = scalar_lea.vmem %s1032_s5, 32 }
  0x37   : > { %p753_p6 = scmp.ne.s32.totalorder %s1032_s5, %s752_s29  ;;  %p760_p3 = scmp.lt.s32.totalorder %s1032_s5, %s1032_s5 }
  0x38   : > { %p761_p5 = scmp.lt.s32.totalorder %s759_s30, %s752_s29 }
  0x39   : > { %p755_p8 = pnand %p753_p6, %p1044_p13 }
  0x3a   : > { %p762_p7 = por %p761_p5, %p760_p3 }
  0x3b   : > { %p756_p0 = pneg %p755_p8 }
  0x3d   : > { %p763_p10 = pnand %p762_p7, %p756_p0 }
  0x3f   : > { %766 = shalt.err (!%p763_p10)
}
  0x40   : > { %620 = dma.hbm_to_vmem [thread:$0]  (!%p1028_p11), %s1273_s2, 16, %s1032_s5, [#allocation6]  }
  0x41   : > { %s767_s12 = scalar_lea.hbm %s1274_s3, 512 }
  0x42   : > { %p768_p9 = scmp.ne.s32.totalorder %s1274_s3, %s767_s12  ;;  %p774_p2 = scmp.lt.u32.totalorder %s767_s12, %s1274_s3 }
  0x44   : > { %p770_p12 = pnand %p768_p9, %p1044_p13 }
  0x46   : > { %p771_p1 = pneg %p770_p12 }
  0x48   : > { %p776_p4 = pnand %p774_p2, %p771_p1 }
  0x4a   : > { %779 = shalt.err (!%p776_p4)
}
  0x4b   : > { %s780_s5 = scalar_lea.vmem %s1034_s8, 512  ;;  %p788_p3 = scmp.lt.s32.totalorder %s1034_s8, %s1034_s8 }
  0x4c   : > { %p781_p6 = scmp.ne.s32.totalorder %s1034_s8, %s780_s5  ;;  %p789_p5 = scmp.lt.s32.totalorder %s780_s5, %s780_s5 }
  0x4e   : > { %p783_p8 = pnand %p781_p6, %p1044_p13  ;;  %p790_p7 = por %p789_p5, %p788_p3 }
  0x50   : > { %p784_p0 = pneg %p783_p8 }
  0x52   : > { %p791_p10 = pnand %p790_p7, %p784_p0 }
  0x54   : > { %794 = shalt.err (!%p791_p10)
}
  0x55   : > { %s920_s29 = smov 128   ;;  %s921_s14 = smov 8  }
  0x56   : > { %623 = dma.hbm_to_vmem [thread:$0]  (!%p1028_p11), %s1274_s3, 512, %s1034_s8, [#allocation9], %s920_s29, %s920_s29, %s921_s14  }
  0x57   : > { %s43_s9 = sadd.s32 1, %s903_s17  ;;  %s34_s10 = sadd.s32 1, %s911_s19 }
  0x58   : > { %p50_p13 = scmp.ne.s32.totalorder %s903_s17, %s899_s16  ;;  %p36_p9 = scmp.ge.s32.totalorder %s34_s10, 2 }
  0x59   : > { %p51_p12 = scmp.eq.s32.totalorder %s915_s20, 0  ;;  %p1287_p1 = scmp.ne.s32.totalorder %s1281_s24, 0 }
  0x5a   : > { %p635_p4 = scmp.lt.s32.totalorder %s915_s20, 2  ;;  %s1301_s10 = smov (%p36_p9, %s34_s10), 0 }
  0x5b   : > { %p1114_p2 = por %p1287_p1, %p50_p13  ;;  %p52_p6 = por %p51_p12, %p50_p13 }
  0x5c   : > { %s206_s6 = sand.u32 1, %s903_s17   ;;  %s38_s12 = ssub.s32 %s911_s19, %s1301_s10 }
  0x5d   : > { %p41_p8 = scmp.eq.s32.totalorder %s38_s12, 0  ;;  %s561_s8 = sshll.u32 %s206_s6, 3 }
  0x5e   : > { %s562_s13 = sshll.u32 %s911_s19, 7  ;;  %s210_s5 = scalar_lea.vmem [#allocation2], %s561_s8 }
  0x5f   : > { %s1126_s21 = scalar_select %p41_p8, %s903_s17, %s43_s9  }
  0x60   : > { %s1131_s24 = scalar_lea.hbm %s1271_s0, %s562_s13  ;;  %s218_s29 = sshll.u32 %s210_s5, 4  ;;  %s1133_s29 = int_to_ptr.vmem [resolvable:$true] %s218_s29 }
  0x61   : > { %p1137_p11 = pnand %p635_p4, %p52_p6  ;;  %s207_s30 = scalar_lea.sflag [#allocation3], %s206_s6 }
  0x62   : > { %s795_s7 = scalar_lea.hbm %s1131_s24, 128  ;;  %s800_s8 = scalar_lea.hbm %s1271_s0, 256 }
  0x63   : > { %p796_p0 = scmp.ne.s32.totalorder %s1131_s24, %s795_s7  ;;  %p797_p3 = pneg %p1137_p11 }
  0x64   : > { %p801_p10 = scmp.lt.u32.totalorder %s1131_s24, %s1271_s0  ;;  %p802_p13 = scmp.lt.u32.totalorder %s800_s8, %s795_s7 }
  0x65   : > { %p798_p5 = pnand %p797_p3, %p796_p0  ;;  %p804_p12 = scmp.lt.u32.totalorder %s795_s7, %s1131_s24 }
  0x66   : > { %p803_p9 = por %p802_p13, %p801_p10 }
  0x67   : > { %p799_p7 = pneg %p798_p5 }
  0x68   : > { %p805_p1 = por %p804_p12, %p803_p9 }
  0x6a   : > { %p806_p4 = pnand %p805_p1, %p799_p7 }
  0x6c   : > { %809 = shalt.err (!%p806_p4)
}
  0x6d   : > { %s810_s6 = scalar_lea.vmem %s1133_s29, 128  ;;  %s922_s28 = smov [#allocation2]  }
  0x6e   : > { %p811_p6 = scmp.ne.s32.totalorder %s1133_s29, %s810_s6  ;;  %s815_s5 = sshll.u32 %s922_s28, 4  ;;  %s816_s5 = int_to_ptr.vmem [resolvable:$false] %s815_s5 }
  0x6f   : > { %s817_s9 = scalar_lea.vmem %s816_s5, 256  ;;  %p818_p5 = scmp.lt.s32.totalorder %s1133_s29, %s816_s5 }
  0x70   : > { %p813_p8 = pnand %p811_p6, %p797_p3  ;;  %p819_p10 = scmp.lt.s32.totalorder %s817_s9, %s810_s6 }
  0x72   : > { %p814_p0 = pneg %p813_p8  ;;  %p820_p13 = por %p819_p10, %p818_p5 }
  0x74   : > { %p821_p9 = pnand %p820_p13, %p814_p0 }
  0x76   : > { %824 = shalt.err (!%p821_p9)
}
  0x77   : > { %627 = dma.hbm_to_vmem [thread:$0]  (!%p1137_p11), %s1131_s24, 128, %s1133_s29, %s207_s30  }
  0x78   : > { %p1290_p7 = scmp.ne.s32.totalorder %s1284_s27, 0 }
  0x79   : > { %s1169_s7 = sand.u32 (!%p1290_p7), 1, %s899_s16   ;;  %p1291_p3 = scmp.ne.s32.totalorder (!%p1290_p7), %s1282_s25, 0 }
  0x7a   : > { %227 = sbr.rel (%p1290_p7) target bundleno = 823 (0x337), region = 36  ;;  %s564_s12 = sshll.u32 (!%p1290_p7), %s1169_s7, 3 }
  0x7b   : > { %s230_s8 = scalar_lea.sflag (!%p1290_p7), [#allocation3], %s1169_s7  ;;  %s233_s13 = scalar_lea.vmem (!%p1290_p7), [#allocation2], %s564_s12 }
  0x81   : > { %878 = dma.done.wait (%p1291_p3), %s230_s8, 128  }
  0x82   : > { %880 = vsyncadd (%p1291_p3), %s230_s8, 4294967168  ;;  %p1292_p12 = scmp.ne.s32.totalorder %s1280_s23, 0 }
  0x84   : > { %882 = dma.done.wait (%p1292_p12), [#allocation6], 32  }
  0x85   : > { %884 = vsyncadd (%p1292_p12), [#allocation6], 4294967264 }
  0x86   : > { %886 = dma.done.wait (%p1292_p12), [#allocation9], 512  }
  0x87   : > { %888 = vsyncadd (%p1292_p12), [#allocation9], 4294966784  ;;  %vm273_vm0 = vcmask 261120   ;;  %v270_v0 = vld [vmem:[%s233_s13] sm:$0xff]  ;;  %v302_v7 = vld [vmem:[#allocation8] sm:$0xff]  ;;  %v923_v10 = vmov 0.0|0.0  }
  0x88   : > { %v274_v1 = vsel %vm273_vm0, %v270_v0, 0.0  ;;  %v303_v8 = vld [vmem:[#allocation8 + $0x8] sm:$0xff]  ;;  %v304_v9 = vld [vmem:[#allocation8 + $0x10] sm:$0xff]  ;;  %590 = vmatprep.subr.bf16.mxu0 %v923_v10  ;;  %v305_v12 = vld [vmem:[#allocation8 + $0x18] sm:$0xff]  ;;  %vm924_vm1 = vmmov 0   ;;  %v925_v13 = vmov 0.0  }
  0x89   : > { %275 = vadd.xlane.f32.xlu0 %v274_v1  ;;  %v591_v11 = vpack.c.bf16 %v303_v8, %v302_v7  ;;  %587 = vmatprep.mubr.msk.f32.mxu0 %vm924_vm1, %v925_v13  ;;  %v594_v14 = vpack.c.bf16 %v305_v12, %v304_v9  ;;  %v568_v19 = vld [vmem:[#allocation5] ss:$0 sm:$0xff]  ;;  %v569_v21 = vld [vmem:[#allocation7] ss:$0 sm:$0xff]  ;;  %s596_s23 = smul.u32 96, %s1169_s7  ;;  %vm413_vm2 = vcmask 64512  }
  0x8a   : > { %s926_s25 = smov 104   ;;  %s927_s27 = smov 120  }
  0x8b   : > { %592 = vmatpush3.bf16.msra.mxu0 %v591_v11  ;;  %s1189_s24 = scalar_lea.vmem [#allocation10], %s596_s23  ;;  %s928_s29 = smov 48  }
  0x8c   : > { %593 = vmatprep.subr.bf16.mxu0 %v923_v10  ;;  %s929_s14 = smov 112   ;;  %s930_s30 = smov 96  }
  0x8d   : > { %s931_s22 = smov 88   ;;  %s932_s6 = smov 80  }
  0x8e   : > { %s933_s28 = smov 72   ;;  %s934_s5 = smov 64  }
  0x8f   : > { %595 = vmatpush3.bf16.msra.mxu0 %v594_v14  ;;  %s935_s9 = smov 56   ;;  %s936_s12 = smov 40  }
  0x90   : > { %s597_s8 = smul.u32 1536, %s907_s18  ;;  %s441_s13 = sshll.u32 %s1189_s24, 4  ;;  %s1220_s13 = int_to_ptr.vmem [resolvable:$true] %s441_s13 }
  0x91   : > { %s937_s18 = smov [#allocation10]  }
 0x116   : > { %v276_v2 = vpop.xlane.xlu0 %275 }
 0x117   : > { %v278_v3 = vmul.f32 0.03125, %v276_v2 }
 0x119   : > { %v279_v4 = vsub.f32 %v270_v0, %v278_v3 }
 0x11b   : > { %v280_v5 = vmul.f32 %v279_v4, %v279_v4 }
 0x11d   : > { %v281_v6 = vsel %vm273_vm0, %v280_v5, 0.0 }
 0x11e   : > { %282 = vadd.xlane.f32.xlu0 %v281_v6 }
 0x1ab   : > { %v283_v15 = vpop.xlane.xlu0 %282 }
 0x1ac   : > { %v284_v16 = vmul.f32 0.03125, %v283_v15 }
 0x1ae   : > { %v285_v17 = vadd.f32 1e-05, %v284_v16 }
 0x1b0   : > { %709 = vrsqrt.f32 %v285_v17 }
 0x1ba   : > { %v710_v18 = vpop.eup %709 }
 0x1bb   : > { %v287_v20 = vmul.f32 %v710_v18, %v279_v4 }
 0x1bd   : > { %v294_v22 = vmul.f32 %v568_v19, %v287_v20 }
 0x1bf   : > { %v301_v23 = vadd.f32 %v569_v21, %v294_v22 }
 0x1c1   : > { %588 = vmatmul.mubr.msk.f32.vlgmr.msra.gmra.mrb[0].mxu0 %vm273_vm0, %v301_v23 }
 0x294   : > { %v375_v24 = vpop.f32.mrb[0].mxu0 }
 0x295   : > { %386 = vrot.lane.b32.xlu0 %v375_v24, %s926_s25  ;;  %380 = vrot.lane.b32.xlu1 %v375_v24, %s927_s27  ;;  %v589_v25 = vpop.f32.mrb[1].mxu0  ;;  %414 = vst.msk [vmem:[%s1189_s24] sm:$0xff] %vm413_vm2, %v375_v24  ;;  %s1218_s27 = scalar_lea.hbm %s1275_s4, %s597_s8 }
 0x299   : > { %407 = vrot.lane.b32.xlu0 %v375_v24, %s928_s29  ;;  %383 = vrot.lane.b32.xlu1 %v375_v24, %s929_s14  ;;  %s427_s29 = scalar_lea.sflag [#allocation4], %s1169_s7  ;;  %s825_s14 = scalar_lea.vmem %s1220_s13, 1536 }
 0x29a   : > { %p826_p11 = scmp.ne.s32.totalorder %s1220_s13, %s825_s14 }
 0x29c   : > { %p827_p1 = pnand %p826_p11, %p1114_p2 }
 0x29d   : > { %389 = vrot.lane.b32.xlu1 %v375_v24, %s930_s30  ;;  %s829_s30 = sshll.u32 %s937_s18, 4  ;;  %s830_s30 = int_to_ptr.vmem [resolvable:$false] %s829_s30 }
 0x29e   : > { %p828_p4 = pneg %p827_p1  ;;  %p832_p6 = scmp.lt.s32.totalorder %s1220_s13, %s830_s30 }
 0x2a1   : > { %392 = vrot.lane.b32.xlu1 %v375_v24, %s931_s22  ;;  %s831_s22 = scalar_lea.vmem %s830_s30, 3072 }
 0x2a2   : > { %p833_p8 = scmp.lt.s32.totalorder %s831_s22, %s825_s14 }
 0x2a4   : > { %p834_p0 = por %p833_p8, %p832_p6 }
 0x2a5   : > { %395 = vrot.lane.b32.xlu1 %v375_v24, %s932_s6 }
 0x2a6   : > { %p835_p5 = pnand %p834_p0, %p828_p4 }
 0x2a9   : > { %398 = vrot.lane.b32.xlu1 %v375_v24, %s933_s28 }
 0x2ad   : > { %401 = vrot.lane.b32.xlu1 %v375_v24, %s934_s5 }
 0x2b1   : > { %404 = vrot.lane.b32.xlu1 %v375_v24, %s935_s9 }
 0x2b5   : > { %410 = vrot.lane.b32.xlu1 %v375_v24, %s936_s12 }
 0x307   : > { %v387_v26 = vpop.permute.xlu0 %386  ;;  %v381_v27 = vpop.permute.xlu1 %380 }
 0x308   : > { %417 = vst.msk [vmem:[%s1189_s24 + $0x18] sm:$0xff] %vm413_vm2, %v387_v26  ;;  %415 = vst.msk [vmem:[%s1189_s24 + $0x8] sm:$0xff] %vm413_vm2, %v381_v27 }
 0x30b   : > { %v408_v28 = vpop.permute.xlu0 %407  ;;  %v384_v29 = vpop.permute.xlu1 %383 }
 0x30c   : > { %424 = vst.msk [vmem:[%s1189_s24 + $0x50] sm:$0xff] %vm413_vm2, %v408_v28  ;;  %416 = vst.msk [vmem:[%s1189_s24 + $0x10] sm:$0xff] %vm413_vm2, %v384_v29 }
 0x30f   : > { %v390_v30 = vpop.permute.xlu1 %389 }
 0x310   : > { %418 = vst.msk [vmem:[%s1189_s24 + $0x20] sm:$0xff] %vm413_vm2, %v390_v30 }
 0x313   : > { %v393_v31 = vpop.permute.xlu1 %392 }
 0x314   : > { %419 = vst.msk [vmem:[%s1189_s24 + $0x28] sm:$0xff] %vm413_vm2, %v393_v31 }
 0x317   : > { %v396_v32 = vpop.permute.xlu1 %395 }
 0x318   : > { %420 = vst.msk [vmem:[%s1189_s24 + $0x30] sm:$0xff] %vm413_vm2, %v396_v32 }
 0x31b   : > { %v399_v33 = vpop.permute.xlu1 %398 }
 0x31c   : > { %421 = vst.msk [vmem:[%s1189_s24 + $0x38] sm:$0xff] %vm413_vm2, %v399_v33 }
 0x31f   : > { %v402_v34 = vpop.permute.xlu1 %401 }
 0x320   : > { %422 = vst.msk [vmem:[%s1189_s24 + $0x40] sm:$0xff] %vm413_vm2, %v402_v34 }
 0x323   : > { %v405_v35 = vpop.permute.xlu1 %404 }
 0x324   : > { %423 = vst.msk [vmem:[%s1189_s24 + $0x48] sm:$0xff] %vm413_vm2, %v405_v35 }
 0x327   : > { %v411_v36 = vpop.permute.xlu1 %410 }
 0x328   : > { %425 = vst.msk [vmem:[%s1189_s24 + $0x58] sm:$0xff] %vm413_vm2, %v411_v36 }
 0x329   : > { %838 = shalt.err (!%p835_p5)
}
 0x32a   : > { %s839_s24 = scalar_lea.hbm %s1218_s27, 1536  ;;  %s843_s5 = scalar_lea.hbm %s1275_s4, 3072 }
 0x32b   : > { %p840_p10 = scmp.ne.s32.totalorder %s1218_s27, %s839_s24  ;;  %p844_p7 = scmp.lt.u32.totalorder %s1218_s27, %s1275_s4 }
 0x32c   : > { %p845_p3 = scmp.lt.u32.totalorder %s843_s5, %s839_s24  ;;  %p847_p11 = scmp.lt.u32.totalorder %s839_s24, %s1218_s27 }
 0x32d   : > { %p841_p13 = pnand %p840_p10, %p1114_p2 }
 0x32e   : > { %p846_p12 = por %p845_p3, %p844_p7 }
 0x32f   : > { %p842_p9 = pneg %p841_p13 }
 0x330   : > { %p848_p1 = por %p847_p11, %p846_p12 }
 0x332   : > { %p849_p4 = pnand %p848_p1, %p842_p9 }
 0x334   : > { %852 = shalt.err (!%p849_p4)
}
 0x335   : > { %s938_s8 = smov 128   ;;  %s939_s23 = smov 8  }
 0x336   : > { %612 = dma.vmem_to_hbm [thread:$0]  (%p1114_p2), %s1220_s13, 1536, %s1218_s27, %s427_s29, %s938_s8, %s938_s8, %s939_s23  }
 0x337 PF: > { %s456_s25 = sand.u32 1, %s895_s15   ;;  %p1293_p6 = scmp.ne.s32.totalorder %s1283_s26, 0 }
 0x338   : > { %p1294_p8 = scmp.ge.s32.totalorder %s915_s20, 2  ;;  %s457_s14 = scalar_lea.sflag [#allocation4], %s456_s25 }
 0x33a   : > { %p629_p0 = pnand %p1294_p8, %p1293_p6 }
 0x33c   : > { %890 = dma.done.wait (!%p629_p0), %s457_s14, 1536  }
 0x33d   : > { %892 = vsyncadd (!%p629_p0), %s457_s14, 4294965760  ;;  %s22_s20 = sadd.s32 1, %s915_s20   ;;  %s1295_s15 = smov %s899_s16 }
 0x33e   : > { %p19_p5 = scmp.ge.s32.totalorder %s22_s20, 4   ;;  %s1296_s16 = smov %s903_s17 }
 0x33f   : > { %s1297_s17 = smov %s1126_s21  ;;  %s1298_s18 = smov %s911_s19 }
 0x340   : > { %s1299_s19 = smov %s1301_s10  ;;  %21 = sbr.rel (!%p19_p5) target bundleno = 8 (0x8), region = 93 }
 0x347   :  { %462 = vsyncpa [#allocation3], 1 }
 0x348   :  { %464 = vsyncpa [#allocation3 + $0x1], 1 }
 0x349   :  { %465 = vsyncpa [#allocation6], 1 }
 0x34a   :  { %466 = vsyncpa [#allocation9], 1 }
 0x34b   :  { %467 = vsyncpa [#allocation4], 1 }
 0x34c   :  { %469 = vsyncpa [#allocation4 + $0x1], 1 }

</bundles_post_ra>
